<compile_context>
chip_gen: v7x
topology: tpu7x:2x2x1
jax: 0.10.0
libtpu: 0.0.40
codegen_flags: <defaults>
</compile_context>

<pallas_src>
import functools

import jax
import jax.numpy as jnp
from jax.experimental import pallas as pl
from jax.experimental.pallas import tpu as pltpu


# ---------------------------------------------------------------------------
# Fused kernel: encoder (once, at grid step 0) + symmetric row-tiled decoder + mean.
# ---------------------------------------------------------------------------
def _fused_vgae_kernel(adj_ref, x_ref, w1_ref, wmu_ref, out_ref,
                       z_ref, zT_ref, acc_ref, *, tm, n_valid, tanh_dtype):
    i = pl.program_id(0)
    num_tiles = pl.num_programs(0)
    cd = adj_ref.dtype  # MXU operand dtype (f32 or bf16); accumulation is always f32
    f32_tanh = jnp.dtype(tanh_dtype) == jnp.dtype(jnp.float32)

    @pl.when(i == 0)
    def _encode():
        # h1 = ReLU(adj @ (X @ W1)); z = mu = adj @ (h1 @ Wmu). Kept in VMEM scratch.
        xw = jnp.dot(x_ref[...], w1_ref[...], preferred_element_type=jnp.float32)
        h1 = jnp.maximum(
            jnp.dot(adj_ref[...], xw.astype(cd), preferred_element_type=jnp.float32),
            0.0)
        hw = jnp.dot(h1.astype(cd), wmu_ref[...], preferred_element_type=jnp.float32)
        z = jnp.dot(adj_ref[...], hw.astype(cd), preferred_element_type=jnp.float32)
        z_ref[...] = z.astype(cd)                       # decoder LHS, already in cd
        # Decoder RHS, written once: lane-dense (K=l, N=npad), pre-scaled by 0.5
        # (folds the 0.5*x of sigmoid(x) = 0.5*tanh(0.5*x) + 0.5 into this write).
        zT_ref[...] = (jnp.transpose(z) * 0.5).astype(cd)
        acc_ref[...] = jnp.zeros_like(acc_ref)

    # Row tile for this grid step (no per-step cast — z_ref already in cd).
    row0 = pl.multiple_of(i * tm, tm)
    z_tile = z_ref[pl.ds(row0, tm), :]

    def block_slab(j):
        # (tm, 128) slab of tanh(0.5 * z[row tile] @ z[col block j].T).
        col0 = pl.multiple_of(j * tm, tm)
        logits = jnp.dot(z_tile, zT_ref[:, pl.ds(col0, tm)],
                         preferred_element_type=jnp.float32)
        if f32_tanh:
            t = jnp.tanh(logits)
        else:
            # bf16 EUP (v6e/v7x): ~2x transcendental throughput; accumulate in f32.
            t = jnp.tanh(logits.astype(tanh_dtype)).astype(jnp.float32)
        if tm == 128:
            return t
        return t.reshape(tm, tm // 128, 128).sum(axis=1)

    # Symmetry of mu @ mu.T: only column blocks j >= i; off-diagonal counted twice.
    diag = block_slab(i)
    off = jax.lax.fori_loop(i + 1, num_tiles,
                            lambda j, c: c + block_slab(j),
                            jnp.zeros((tm, 128), jnp.float32))
    acc_ref[...] += diag + 2.0 * off

    @pl.when(i == num_tiles - 1)
    def _finalize():
        # mean(sigmoid(logits)) over the valid n x n block
        #   = 0.5 + 0.5/n^2 * sum(tanh(0.5 * logits_valid)).
        # Padded rows/cols of z are exactly 0 (adj/X are zero-padded), so padded
        # entries contribute tanh(0) = 0 exactly — no mask / correction needed.
        total = jnp.sum(acc_ref[...], keepdims=True)    # single cross-lane reduce
        out_ref[...] = 0.5 + total * (0.5 / float(n_valid * n_valid))


# ---------------------------------------------------------------------------
# Wrapper.
# ---------------------------------------------------------------------------
def _default_tanh_dtype():
    """bf16 tanh on chips with a bf16 EUP (v6e/v7x); f32 elsewhere (v5e)."""
    try:
        kind = jax.devices()[0].device_kind.lower()
    except Exception:
        return jnp.float32
    if any(s in kind for s in ("v6", "v7", "7x")):
        return jnp.bfloat16
    return jnp.float32


@functools.lru_cache(maxsize=None)
def _single_buffer_supported():
    """Probe whether pipeline_mode=pl.Buffered(1) lowers on this jax/libtpu."""
    try:
        def k(x_ref, o_ref):
            o_ref[...] = x_ref[...] + 1.0
        x = jnp.zeros((8, 128), jnp.float32)
        out = pl.pallas_call(
            k,
            out_shape=jax.ShapeDtypeStruct((8, 128), jnp.float32),
            grid=(1,),
            in_specs=[pl.BlockSpec((8, 128), lambda i: (0, 0),
                                   pipeline_mode=pl.Buffered(1))],
            out_specs=pl.BlockSpec((8, 128), lambda i: (0, 0)),
        )(x)
        jax.block_until_ready(out)
        return True
    except Exception:
        return False


@functools.partial(
    jax.jit,
    static_argnames=("tm", "compute_dtype", "tanh_dtype", "single_buffer"))
def _compute_likelihood(params, X, adj, *, tm, compute_dtype, tanh_dtype,
                        single_buffer):
    n, f = X.shape
    h = params["w1"].shape[1]
    l = params["w_mu"].shape[1]
    assert tm % 128 == 0, "decoder row tile must be a multiple of 128 lanes"

    npad = pl.cdiv(n, tm) * tm
    pad = npad - n
    # Zero padding is REQUIRED: it makes padded z rows exactly 0, which the analytic
    # mean correction in the kernel relies on (tanh(0) contributions vanish).
    adj_p = jnp.pad(adj, ((0, pad), (0, pad))).astype(compute_dtype)
    x_p = jnp.pad(X, ((0, pad), (0, 0))).astype(compute_dtype)
    w1 = params["w1"].astype(compute_dtype)
    wmu = params["w_mu"].astype(compute_dtype)
    # NOTE: params["w_lv"] (logvar head) intentionally unused — dead for forward().

    # Explicit VMEM budget: single-buffered resident inputs + scratch + a rough bound
    # on encoder/decoder temporaries + headroom.
    itm = jnp.dtype(compute_dtype).itemsize
    in_bytes = (npad * npad + npad * f + f * h + h * l) * itm
    scr_bytes = 2 * npad * l * itm + tm * 128 * 4
    tmp_bytes = 2 * npad * h * 4 + 2 * npad * l * 4 + 4 * tm * tm * 4
    vmem_limit = int(min(max(in_bytes + scr_bytes + tmp_bytes + (8 << 20), 32 << 20),
                         100 << 20))

    def const_spec(shape):
        # Constant index_map => the block is resident; double-buffering buys nothing.
        if single_buffer:
            return pl.BlockSpec(shape, lambda i: (0, 0),
                                pipeline_mode=pl.Buffered(1))
        return pl.BlockSpec(shape, lambda i: (0, 0))

    out = pl.pallas_call(
        functools.partial(_fused_vgae_kernel, tm=tm, n_valid=n,
                          tanh_dtype=tanh_dtype),
        out_shape=jax.ShapeDtypeStruct((1, 1), jnp.float32),
        grid=(npad // tm,),
        in_specs=[
            const_spec((npad, npad)),   # adj (resident, fetched once)
            const_spec((npad, f)),      # X
            const_spec((f, h)),         # W1
            const_spec((h, l)),         # W_mu
        ],
        out_specs=pl.BlockSpec((1, 1), lambda i: (0, 0)),
        scratch_shapes=[
            pltpu.VMEM((npad, l), compute_dtype),   # z (decoder LHS), persists
            pltpu.VMEM((l, npad), compute_dtype),   # 0.5 * z^T (decoder RHS), persists
            pltpu.VMEM((tm, 128), jnp.float32),     # wide partial-sum accumulator
        ],
        # Shared accumulator + step-0 encoder => reduction axis, must be "arbitrary".
        compiler_params=pltpu.CompilerParams(
            dimension_semantics=("arbitrary",),
            vmem_limit_bytes=vmem_limit),
    )(adj_p, x_p, w1, wmu)
    return out[0, 0]


def compute_likelihood(params, X, adj, *, tm=128, compute_dtype=jnp.bfloat16,
                       tanh_dtype=None):
    """Pallas implementation of LikelihoodComputer.forward() (eval semantics)."""
    if tanh_dtype is None:
        tanh_dtype = _default_tanh_dtype()
    return _compute_likelihood(
        params, X, adj, tm=tm,
        compute_dtype=jnp.dtype(compute_dtype),
        tanh_dtype=jnp.dtype(tanh_dtype),
        single_buffer=_single_buffer_supported())


# ---------------------------------------------------------------------------
# Plain-JAX glue: parameter init, adjacency normalization, reference.
# ---------------------------------------------------------------------------
def glorot(key, shape):
    lim = jnp.sqrt(6.0 / (shape[0] + shape[1]))
    return jax.random.uniform(key, shape, jnp.float32, minval=-lim, maxval=lim)


def init_params(key, in_dim, hidden_dim, latent_dim):
    k1, k2, k3 = jax.random.split(key, 3)
    return {
        "w1": glorot(k1, (in_dim, hidden_dim)),
        "w_mu": glorot(k2, (hidden_dim, latent_dim)),
        "w_lv": glorot(k3, (hidden_dim, latent_dim)),  # unused by forward()
    }


def normalize_adj(adj_raw):
    # A_hat = D^-1/2 (A + I) D^-1/2
    n = adj_raw.shape[0]
    a = adj_raw + jnp.eye(n, dtype=jnp.float32)
    deg = jnp.sum(a, axis=1)
    d_inv_sqrt = 1.0 / jnp.sqrt(deg)
    return a * d_inv_sqrt[:, None] * d_inv_sqrt[None, :]


def compute_likelihood_ref(params, X, adj):
    h1 = jnp.maximum(adj @ (X @ params["w1"]), 0.0)
    mu = adj @ (h1 @ params["w_mu"])
    return jnp.mean(jax.nn.sigmoid(mu @ mu.T))


# TODO(synk): training-mode reparameterization (z = mu + eps * exp(logvar)) is
# stochastic; forward()/ComputeLikelihood() uses the deterministic mean embedding.

if __name__ == "__main__":
    hidden_dim, latent = 64, 16
    key = jax.random.PRNGKey(0)

    # Two small configs: N=128 (exact tile) and N=192 (padding + multi-tile symmetry).
    for n_nodes, feat in [(128, 32), (192, 32)]:
        key, kx, ka, kp = jax.random.split(key, 4)
        X = jax.random.normal(kx, (n_nodes, feat), dtype=jnp.float32)
        upper = (jax.random.uniform(ka, (n_nodes, n_nodes)) < 0.05).astype(jnp.float32)
        adj_raw = jnp.triu(upper, k=1)
        adj_raw = adj_raw + adj_raw.T
        adj = normalize_adj(adj_raw)
        params = init_params(kp, feat, hidden_dim, latent)

        ref = jax.block_until_ready(compute_likelihood_ref(params, X, adj))

        # Tight numerical check: f32 MXU operands, f32 tanh.
        out_f32 = jax.block_until_ready(
            compute_likelihood(params, X, adj,
                               compute_dtype=jnp.float32, tanh_dtype=jnp.float32))
        assert jnp.isfinite(out_f32), "non-finite likelihood (f32)"
        assert jnp.abs(out_f32 - ref) < 2e-4, (n_nodes, float(out_f32), float(ref))

        # Fast path: bf16 MXU operands; tanh dtype auto (bf16 on v6e/v7x, f32 on v5e).
        out_fast = jax.block_until_ready(compute_likelihood(params, X, adj))
        assert jnp.isfinite(out_fast), "non-finite likelihood (fast path)"
        assert jnp.abs(out_fast - ref) < 2e-2, (n_nodes, float(out_fast), float(ref))

    print("KERNEL_OK")
</pallas_src>

<mosaic_0001>
module attributes {stable_mosaic.version = 11 : i64} {
  func.func @k(%arg0: i32, %arg1: memref<8x128xf32, #tpu.memory_space<vmem>>, %arg2: memref<8x128xf32, #tpu.memory_space<vmem>>) attributes {dimension_semantics = [#tpu.dimension_semantics<arbitrary>], iteration_bounds = array<i64: 1>, scalar_prefetch = 0 : i64, scratch_operands = 0 : i64, tpu.core_type = #tpu.core_type<tc>, window_params = [{pipeline_mode = #tpu.pipeline_mode<synchronous>, transform_indices = @transform_0, window_bounds = array<i64: 8, 128>}, {pipeline_mode = #tpu.pipeline_mode<synchronous>, transform_indices = @transform_1, window_bounds = array<i64: 8, 128>}]} {
    %c0 = arith.constant 0 : index
    %c0_0 = arith.constant 0 : index
    %0 = vector.load %arg1[%c0, %c0_0] : memref<8x128xf32, #tpu.memory_space<vmem>>, vector<8x128xf32>
    %cst = arith.constant 1.000000e+00 : f32
    %1 = vector.broadcast %cst : f32 to vector<8x128xf32>
    %2 = arith.addf %0, %1 : vector<8x128xf32>
    %c0_1 = arith.constant 0 : index
    %c0_2 = arith.constant 0 : index
    %3 = vector.load %arg2[%c0_1, %c0_2] : memref<8x128xf32, #tpu.memory_space<vmem>>, vector<8x128xf32>
    tpu.vector_store %arg2[%c0_1, %c0_2], %2 {strides = array<i32>} : memref<8x128xf32, #tpu.memory_space<vmem>>, vector<8x128xf32>,
    return
  }
  func.func @transform_0(%arg0: i32) -> (i32, i32) {
    %c0_i32 = arith.constant 0 : i32
    %c0_i32_0 = arith.constant 0 : i32
    %c0_i32_1 = arith.constant 0 : i32
    return %c0_i32, %c0_i32_0 : i32, i32
  }
  func.func @transform_1(%arg0: i32) -> (i32, i32) {
    %c0_i32 = arith.constant 0 : i32
    %c0_i32_0 = arith.constant 0 : i32
    %c0_i32_1 = arith.constant 0 : i32
    return %c0_i32, %c0_i32_0 : i32, i32
  }
}

module attributes {stable_mosaic.version = 11 : i64} {
  func.func @_fused_vgae_kernel(%arg0: i32, %arg1: memref<128x128xf32, #tpu.memory_space<vmem>>, %arg2: memref<128x32xf32, #tpu.memory_space<vmem>>, %arg3: memref<32x64xf32, #tpu.memory_space<vmem>>, %arg4: memref<64x16xf32, #tpu.memory_space<vmem>>, %arg5: memref<1x1xf32, #tpu.memory_space<vmem>>, %arg6: memref<128x16xf32, #tpu.memory_space<vmem>>, %arg7: memref<16x128xf32, #tpu.memory_space<vmem>>, %arg8: memref<128x128xf32, #tpu.memory_space<vmem>>) attributes {dimension_semantics = [#tpu.dimension_semantics<arbitrary>], iteration_bounds = array<i64: 1>, scalar_prefetch = 0 : i64, scratch_operands = 3 : i64, tpu.core_type = #tpu.core_type<tc>, window_params = [{pipeline_mode = #tpu.pipeline_mode<synchronous>, transform_indices = @transform_0, window_bounds = array<i64: 128, 128>}, {pipeline_mode = #tpu.pipeline_mode<synchronous>, transform_indices = @transform_1, window_bounds = array<i64: 128, 32>}, {pipeline_mode = #tpu.pipeline_mode<synchronous>, transform_indices = @transform_2, window_bounds = array<i64: 32, 64>}, {pipeline_mode = #tpu.pipeline_mode<synchronous>, transform_indices = @transform_3, window_bounds = array<i64: 64, 16>}, {pipeline_mode = #tpu.pipeline_mode<synchronous>, transform_indices = @transform_4, window_bounds = array<i64: 1, 1>}]} {
    %c0_i32 = arith.constant 0 : i32
    %0 = arith.cmpi eq, %arg0, %c0_i32 : i32
    %1 = arith.extui %0 : i1 to i32
    %c0_i32_0 = arith.constant 0 : i32
    %2 = arith.cmpi ne, %1, %c0_i32_0 : i32
    scf.if %2 {
      %c0_13 = arith.constant 0 : index
      %c0_14 = arith.constant 0 : index
      %27 = vector.load %arg2[%c0_13, %c0_14] : memref<128x32xf32, #tpu.memory_space<vmem>>, vector<128x32xf32>
      %c0_15 = arith.constant 0 : index
      %c0_16 = arith.constant 0 : index
      %28 = vector.load %arg3[%c0_15, %c0_16] : memref<32x64xf32, #tpu.memory_space<vmem>>, vector<32x64xf32>
      %cst_17 = arith.constant dense<0.000000e+00> : vector<128x64xf32>
      %29 = tpu.matmul %27, %28, %cst_17 {dimension_numbers = #tpu.dot_dimension_numbers<[1], [0], [0], [1], [0, 0, 1, 1], [], []>} : vector<128x32xf32>, vector<32x64xf32>, vector<128x64xf32> -> vector<128x64xf32>
      %c0_18 = arith.constant 0 : index
      %c0_19 = arith.constant 0 : index
      %30 = vector.load %arg1[%c0_18, %c0_19] : memref<128x128xf32, #tpu.memory_space<vmem>>, vector<128x128xf32>
      %cst_20 = arith.constant dense<0.000000e+00> : vector<128x64xf32>
      %31 = tpu.matmul %30, %29, %cst_20 {dimension_numbers = #tpu.dot_dimension_numbers<[1], [0], [0], [1], [0, 0, 1, 1], [], []>} : vector<128x128xf32>, vector<128x64xf32>, vector<128x64xf32> -> vector<128x64xf32>
      %cst_21 = arith.constant 0.000000e+00 : f32
      %32 = vector.broadcast %cst_21 : f32 to vector<128x64xf32>
      %33 = arith.maximumf %31, %32 : vector<128x64xf32>
      %c0_22 = arith.constant 0 : index
      %c0_23 = arith.constant 0 : index
      %34 = vector.load %arg4[%c0_22, %c0_23] : memref<64x16xf32, #tpu.memory_space<vmem>>, vector<64x16xf32>
      %cst_24 = arith.constant dense<0.000000e+00> : vector<128x16xf32>
      %35 = tpu.matmul %33, %34, %cst_24 {dimension_numbers = #tpu.dot_dimension_numbers<[1], [0], [0], [1], [0, 0, 1, 1], [], []>} : vector<128x64xf32>, vector<64x16xf32>, vector<128x16xf32> -> vector<128x16xf32>
      %c0_25 = arith.constant 0 : index
      %c0_26 = arith.constant 0 : index
      %36 = vector.load %arg1[%c0_25, %c0_26] : memref<128x128xf32, #tpu.memory_space<vmem>>, vector<128x128xf32>
      %cst_27 = arith.constant dense<0.000000e+00> : vector<128x16xf32>
      %37 = tpu.matmul %36, %35, %cst_27 {dimension_numbers = #tpu.dot_dimension_numbers<[1], [0], [0], [1], [0, 0, 1, 1], [], []>} : vector<128x128xf32>, vector<128x16xf32>, vector<128x16xf32> -> vector<128x16xf32>
      %c0_28 = arith.constant 0 : index
      %c0_29 = arith.constant 0 : index
      %38 = vector.load %arg6[%c0_28, %c0_29] : memref<128x16xf32, #tpu.memory_space<vmem>>, vector<128x16xf32>
      tpu.vector_store %arg6[%c0_28, %c0_29], %37 {strides = array<i32>} : memref<128x16xf32, #tpu.memory_space<vmem>>, vector<128x16xf32>,
      %39 = tpu.transpose %37, [1, 0] : vector<128x16xf32> -> vector<16x128xf32>
      %cst_30 = arith.constant 5.000000e-01 : f32
      %40 = vector.broadcast %cst_30 : f32 to vector<16x128xf32>
      %41 = arith.mulf %39, %40 : vector<16x128xf32>
      %c0_31 = arith.constant 0 : index
      %c0_32 = arith.constant 0 : index
      %42 = vector.load %arg7[%c0_31, %c0_32] : memref<16x128xf32, #tpu.memory_space<vmem>>, vector<16x128xf32>
      tpu.vector_store %arg7[%c0_31, %c0_32], %41 {strides = array<i32>} : memref<16x128xf32, #tpu.memory_space<vmem>>, vector<16x128xf32>,
      %cst_33 = arith.constant 0.000000e+00 : f32
      %43 = vector.broadcast %cst_33 : f32 to vector<128x128xf32>
      %c0_34 = arith.constant 0 : index
      %c0_35 = arith.constant 0 : index
      %44 = vector.load %arg8[%c0_34, %c0_35] : memref<128x128xf32, #tpu.memory_space<vmem>>, vector<128x128xf32>
      tpu.vector_store %arg8[%c0_34, %c0_35], %43 {strides = array<i32>} : memref<128x128xf32, #tpu.memory_space<vmem>>, vector<128x128xf32>,
    } else {
    }
    %c128_i32 = arith.constant 128 : i32
    %3 = arith.muli %arg0, %c128_i32 : i32
    %4 = tpu.assume_multiple %3, 128 : i32
    %5 = arith.index_cast %4 : i32 to index
    %c0 = arith.constant 0 : index
    %6 = vector.load %arg6[%5, %c0] : memref<128x16xf32, #tpu.memory_space<vmem>>, vector<128x16xf32>
    %c128_i32_1 = arith.constant 128 : i32
    %7 = arith.muli %arg0, %c128_i32_1 : i32
    %8 = tpu.assume_multiple %7, 128 : i32
    %c0_2 = arith.constant 0 : index
    %9 = arith.index_cast %8 : i32 to index
    %10 = vector.load %arg7[%c0_2, %9] : memref<16x128xf32, #tpu.memory_space<vmem>>, vector<16x128xf32>
    %cst = arith.constant dense<0.000000e+00> : vector<128x128xf32>
    %11 = tpu.matmul %6, %10, %cst {dimension_numbers = #tpu.dot_dimension_numbers<[1], [0], [0], [1], [0, 0, 1, 1], [], []>} : vector<128x16xf32>, vector<16x128xf32>, vector<128x128xf32> -> vector<128x128xf32>
    %12 = math.tanh %11 : vector<128x128xf32>
    %c1_i32 = arith.constant 1 : i32
    %13 = arith.addi %arg0, %c1_i32 : i32
    %cst_3 = arith.constant 0.000000e+00 : f32
    %14 = vector.broadcast %cst_3 : f32 to vector<128x128xf32>
    %c1_i32_4 = arith.constant 1 : i32
    %15 = arith.subi %c1_i32_4, %13 : i32
    %16 = arith.addi %13, %15 : i32
    %c1_i32_5 = arith.constant 1 : i32
    %17 = scf.for %arg9 = %13 to %16 step %c1_i32_5 iter_args(%arg10 = %14) -> (vector<128x128xf32>)  : i32 {
      %c128_i32_13 = arith.constant 128 : i32
      %27 = arith.muli %arg9, %c128_i32_13 : i32
      %28 = tpu.assume_multiple %27, 128 : i32
      %c0_14 = arith.constant 0 : index
      %29 = arith.index_cast %28 : i32 to index
      %30 = vector.load %arg7[%c0_14, %29] : memref<16x128xf32, #tpu.memory_space<vmem>>, vector<16x128xf32>
      %cst_15 = arith.constant dense<0.000000e+00> : vector<128x128xf32>
      %31 = tpu.matmul %6, %30, %cst_15 {dimension_numbers = #tpu.dot_dimension_numbers<[1], [0], [0], [1], [0, 0, 1, 1], [], []>} : vector<128x16xf32>, vector<16x128xf32>, vector<128x128xf32> -> vector<128x128xf32>
      %32 = math.tanh %31 : vector<128x128xf32>
      %33 = arith.addf %arg10, %32 : vector<128x128xf32>
      scf.yield %33 : vector<128x128xf32>
    }
    %c0_6 = arith.constant 0 : index
    %c0_7 = arith.constant 0 : index
    %18 = vector.load %arg8[%c0_6, %c0_7] : memref<128x128xf32, #tpu.memory_space<vmem>>, vector<128x128xf32>
    %cst_8 = arith.constant 2.000000e+00 : f32
    %19 = vector.broadcast %cst_8 : f32 to vector<128x128xf32>
    %20 = arith.mulf %19, %17 : vector<128x128xf32>
    %21 = arith.addf %12, %20 : vector<128x128xf32>
    %22 = arith.addf %18, %21 : vector<128x128xf32>
    %c0_9 = arith.constant 0 : index
    %c0_10 = arith.constant 0 : index
    %23 = vector.load %arg8[%c0_9, %c0_10] : memref<128x128xf32, #tpu.memory_space<vmem>>, vector<128x128xf32>
    tpu.vector_store %arg8[%c0_9, %c0_10], %22 {strides = array<i32>} : memref<128x128xf32, #tpu.memory_space<vmem>>, vector<128x128xf32>,
    %c0_i32_11 = arith.constant 0 : i32
    %24 = arith.cmpi eq, %arg0, %c0_i32_11 : i32
    %25 = arith.extui %24 : i1 to i32
    %c0_i32_12 = arith.constant 0 : i32
    %26 = arith.cmpi ne, %25, %c0_i32_12 : i32
    scf.if %26 {
      %c0_13 = arith.constant 0 : index
      %c0_14 = arith.constant 0 : index
      %27 = vector.load %arg8[%c0_13, %c0_14] : memref<128x128xf32, #tpu.memory_space<vmem>>, vector<128x128xf32>
      %28 = vector.shape_cast %27 : vector<128x128xf32> to vector<1x128x128xf32>
      %cst_15 = arith.constant dense<0.000000e+00> : vector<1xf32>
      %29 = vector.multi_reduction <add>, %28, %cst_15 [1, 2] : vector<1x128x128xf32> to vector<1xf32>
      %30 = vector.shape_cast %29 : vector<1xf32> to vector<1x1x1xf32>
      %31 = vector.extract %30[0, 0, 0] : f32 from vector<1x1x1xf32>
      %32 = vector.broadcast %31 : f32 to vector<1x1xf32>
      %cst_16 = arith.constant 3.05175781E-5 : f32
      %33 = vector.broadcast %cst_16 : f32 to vector<1x1xf32>
      %34 = arith.mulf %32, %33 : vector<1x1xf32>
      %cst_17 = arith.constant 5.000000e-01 : f32
      %35 = vector.broadcast %cst_17 : f32 to vector<1x1xf32>
      %36 = arith.addf %35, %34 : vector<1x1xf32>
      %c0_18 = arith.constant 0 : index
      %c0_19 = arith.constant 0 : index
      %37 = vector.load %arg5[%c0_18, %c0_19] : memref<1x1xf32, #tpu.memory_space<vmem>>, vector<1x1xf32>
      tpu.vector_store %arg5[%c0_18, %c0_19], %36 {strides = array<i32>} : memref<1x1xf32, #tpu.memory_space<vmem>>, vector<1x1xf32>,
    } else {
    }
    return
  }
  func.func @transform_0(%arg0: i32) -> (i32, i32) {
    %c0_i32 = arith.constant 0 : i32
    %c0_i32_0 = arith.constant 0 : i32
    %c0_i32_1 = arith.constant 0 : i32
    return %c0_i32, %c0_i32_0 : i32, i32
  }
  func.func @transform_1(%arg0: i32) -> (i32, i32) {
    %c0_i32 = arith.constant 0 : i32
    %c0_i32_0 = arith.constant 0 : i32
    %c0_i32_1 = arith.constant 0 : i32
    return %c0_i32, %c0_i32_0 : i32, i32
  }
  func.func @transform_2(%arg0: i32) -> (i32, i32) {
    %c0_i32 = arith.constant 0 : i32
    %c0_i32_0 = arith.constant 0 : i32
    %c0_i32_1 = arith.constant 0 : i32
    return %c0_i32, %c0_i32_0 : i32, i32
  }
  func.func @transform_3(%arg0: i32) -> (i32, i32) {
    %c0_i32 = arith.constant 0 : i32
    %c0_i32_0 = arith.constant 0 : i32
    %c0_i32_1 = arith.constant 0 : i32
    return %c0_i32, %c0_i32_0 : i32, i32
  }
  func.func @transform_4(%arg0: i32) -> (i32, i32) {
    %c0_i32 = arith.constant 0 : i32
    %c0_i32_0 = arith.constant 0 : i32
    %c0_i32_1 = arith.constant 0 : i32
    return %c0_i32, %c0_i32_0 : i32, i32
  }
}

</mosaic_0001>

<bundles_post_ra>
// kernel: tpu_custom_call.1
= control target key start
LH: loop header
LB: loop body
LE: loop exit
PB: predicated region body
PF: predicated region fallthrough
CT: control target
= control target key end

     0   :  { %6 = vsyncpa [#allocation3], 0  ;;  %s125_s0 = inlined_call_operand.hbm [shape: f32[8,128], index: 0, kind: input, shape index: {}]   ;;  %s126_s1 = inlined_call_operand.hbm [shape: f32[8,128], index: 1, kind: output, shape index: {}]  }
   0x1   :  { %7 = vsyncpa [#allocation4], 0  ;;  %s89_s6 = smov [#allocation2]   ;;  %s41_s10 = scalar_lea.hbm %s125_s0, 128 }
   0x2   :  { %s14_s7 = sshll.u32 %s89_s6, 4  ;;  %p42_p0 = scmp.ne.s32.totalorder %s125_s0, %s41_s10  ;;  %s15_s7 = int_to_ptr.vmem [resolvable:$true] %s14_s7 }
   0x3   :  { %p45_p1 = scmp.lt.u32.totalorder %s41_s10, %s125_s0 }
   0x5   :  { %p47_p2 = pnand %p45_p1, %p42_p0 }
   0x7   :  { %50 = shalt.err (!%p47_p2)
}
   0x8   :  { %s51_s15 = scalar_lea.vmem %s15_s7, 128  ;;  %p56_p4 = scmp.lt.s32.totalorder %s15_s7, %s15_s7 }
   0x9   :  { %p52_p3 = scmp.ne.s32.totalorder %s15_s7, %s51_s15  ;;  %p57_p5 = scmp.lt.s32.totalorder %s51_s15, %s51_s15 }
   0xb   :  { %p58_p6 = por %p57_p5, %p56_p4 }
   0xd   :  { %p59_p7 = pnand %p58_p6, %p52_p3 }
   0xf   :  { %62 = shalt.err (!%p59_p7)
}
  0x10   :  { %17 = dma.hbm_to_vmem [thread:$0]  %s125_s0, 128, %s15_s7, [#allocation3]  }
  0x11   :  { %85 = dma.done.wait [#allocation3], 128  }
  0x12   :  { %86 = vsyncadd [#allocation3], 4294967168  ;;  %s90_s18 = smov [#allocation5]   ;;  %v21_v0 = vld [vmem:[#allocation2] sm:$0xff] }
  0x13   :  { %s30_s19 = sshll.u32 %s90_s18, 4  ;;  %v22_v1 = vadd.f32 1.0, %v21_v0  ;;  %s31_s19 = int_to_ptr.vmem [resolvable:$true] %s30_s19 }
  0x14   :  { %s63_s20 = scalar_lea.vmem %s31_s19, 128  ;;  %p68_p9 = scmp.lt.s32.totalorder %s31_s19, %s31_s19 }
  0x15   :  { %23 = vst [vmem:[#allocation5] sm:$0xff] %v22_v1  ;;  %p64_p8 = scmp.ne.s32.totalorder %s31_s19, %s63_s20  ;;  %p69_p10 = scmp.lt.s32.totalorder %s63_s20, %s63_s20 }
  0x17   :  { %p70_p11 = por %p69_p10, %p68_p9 }
  0x19   :  { %p71_p12 = pnand %p70_p11, %p64_p8 }
  0x1b   :  { %74 = shalt.err (!%p71_p12)
}
  0x1c   :  { %s75_s23 = scalar_lea.hbm %s126_s1, 128 }
  0x1d   :  { %p76_p13 = scmp.ne.s32.totalorder %s126_s1, %s75_s23  ;;  %p79_p0 = scmp.lt.u32.totalorder %s75_s23, %s126_s1 }
  0x1f   :  { %p81_p1 = pnand %p79_p0, %p76_p13 }
  0x21   :  { %84 = shalt.err (!%p81_p1)
}
  0x22   :  { %33 = dma.vmem_to_hbm [thread:$0]  %s31_s19, 128, %s126_s1, [#allocation4]  }
  0x23   :  { %87 = dma.done.wait [#allocation4], 128  }
  0x24   :  { %88 = vsyncadd [#allocation4], 4294967168 }
  0x25   :  { %37 = vsyncpa [#allocation3], 1 }
  0x26   :  { %38 = vsyncpa [#allocation4], 1 }

// kernel: _compute_likelihood.1
= control target key start
LH: loop header
LB: loop body
LE: loop exit
PB: predicated region body
PF: predicated region fallthrough
CT: control target
= control target key end

     0   :  { %vm42_vm0 = vcmask 261120   ;;  %s2319_s0 = inlined_call_operand.vmem [shape: f32[128,128], index: 0, kind: input, shape index: {}]   ;;  %s2320_s1 = inlined_call_operand.vmem [shape: f32[128,32], index: 1, kind: input, shape index: {}]   ;;  %s2321_s2 = inlined_call_operand.vmem [shape: f32[32,64], index: 2, kind: input, shape index: {}]   ;;  %s2322_s3 = inlined_call_operand.vmem [shape: f32[64,16], index: 3, kind: input, shape index: {}]   ;;  %s2323_s4 = inlined_call_operand.hbm [shape: f32[1,1], index: 4, kind: output, shape index: {}]  }
   0x1   :  { %v38_v0 = vld [vmem:[%s2321_s2] sm:$0xff]  ;;  %v39_v1 = vld [vmem:[%s2321_s2 + $0x8] sm:$0xff]  ;;  %v40_v2 = vld [vmem:[%s2321_s2 + $0x10] sm:$0xff] }
   0x2   :  { %v1868_v3 = vpack.c.bf16 %v39_v1, %v38_v0  ;;  %v41_v4 = vld [vmem:[%s2321_s2 + $0x18] sm:$0xff]  ;;  %v22_v5 = vld [vmem:[%s2320_s1] sm:$0xff] }
   0x3   :  { %v1872_v6 = vpack.c.bf16 %v41_v4, %v40_v2  ;;  %1664 = vmatprep.mubr.msk.f32.mxu0 %vm42_vm0, %v22_v5 }
   0x4   :  { %1869 = vmatprep.subr.bf16.mxu0 %v1868_v3 }
   0x5   :  { %1871 = vmatpush3.bf16.msra.mxu0 %v1868_v3 }
   0x6   :  { %1873 = vmatprep.subr.bf16.mxu0 %v1872_v6 }
   0x7   :  { %9 = vsyncpa [#allocation6], 0  ;;  %v23_v7 = vld [vmem:[%s2320_s1 + $0x8] sm:$0xff]  ;;  %v24_v8 = vld [vmem:[%s2320_s1 + $0x10] sm:$0xff]  ;;  %vm421_vm1 = vcmask 523264   ;;  %vm760_vm2 = vcmask 130048  }
   0x8   :  { %v25_v9 = vld [vmem:[%s2320_s1 + $0x18] sm:$0xff]  ;;  %v26_v10 = vld [vmem:[%s2320_s1 + $0x20] sm:$0xff]  ;;  %v27_v11 = vld [vmem:[%s2320_s1 + $0x28] sm:$0xff]  ;;  %vm1394_vm3 = vcmask 0  }
   0x9   :  { %1875 = vmatpush3.bf16.msra.mxu0 %v1872_v6  ;;  %v28_v12 = vld [vmem:[%s2320_s1 + $0x30] sm:$0xff]  ;;  %v29_v13 = vld [vmem:[%s2320_s1 + $0x38] sm:$0xff]  ;;  %v30_v14 = vld [vmem:[%s2320_s1 + $0x40] sm:$0xff] }
   0xa   :  { %v31_v15 = vld [vmem:[%s2320_s1 + $0x48] sm:$0xff]  ;;  %v32_v16 = vld [vmem:[%s2320_s1 + $0x50] sm:$0xff]  ;;  %v33_v17 = vld [vmem:[%s2320_s1 + $0x58] sm:$0xff] }
   0xb   :  { %v34_v18 = vld [vmem:[%s2320_s1 + $0x60] sm:$0xff]  ;;  %v35_v19 = vld [vmem:[%s2320_s1 + $0x68] sm:$0xff]  ;;  %v36_v20 = vld [vmem:[%s2320_s1 + $0x70] sm:$0xff] }
   0xc   :  { %1665 = vmatmul.mubr.msk.f32.vlgmr.msra.gmra.mrb[0].mxu0 %vm42_vm0, %v23_v7  ;;  %v37_v21 = vld [vmem:[%s2320_s1 + $0x78] sm:$0xff]  ;;  %v2126_v22 = vld [vmem:[%s2319_s0] sm:$0xff]  ;;  %v414_v24 = vld [vmem:[%s2322_s3 + $0x8] sm:$0xff] }
   0xd   :  { %1667 = vmatprep.mubr.msk.f32.mxu0 %vm42_vm0, %v24_v8  ;;  %1720 = vmatprep.mubr.f32.mxu1 %v2126_v22  ;;  %v413_v23 = vld [vmem:[%s2322_s3] sm:$0xff]  ;;  %v415_v25 = vld [vmem:[%s2322_s3 + $0x10] sm:$0xff]  ;;  %v416_v27 = vld [vmem:[%s2322_s3 + $0x18] sm:$0xff] }
   0xe   :  { %v1908_v26 = vpack.c.bf16 %v414_v24, %v413_v23  ;;  %v1912_v28 = vpack.c.bf16 %v416_v27, %v415_v25  ;;  %v417_v29 = vld [vmem:[%s2322_s3 + $0x20] sm:$0xff]  ;;  %v418_v30 = vld [vmem:[%s2322_s3 + $0x28] sm:$0xff]  ;;  %v2155_v57 = vld [vmem:[%s2319_s0 + $0x10] sm:$0xff] }
   0xf   :  { %v1916_v31 = vpack.c.bf16 %v418_v30, %v417_v29  ;;  %v2150_v56 = vld [vmem:[%s2319_s0 + $0x8] sm:$0xff]  ;;  %v2162_v58 = vld [vmem:[%s2319_s0 + $0x18] sm:$0xff]  ;;  %v2167_v59 = vld [vmem:[%s2319_s0 + $0x20] sm:$0xff] }
  0x10   :  { %1668 = vmatmul.mubr.msk.f32.gmra.mrb[2].mxu0 %vm42_vm0, %v25_v9  ;;  %1909 = vmatprep.subr.bf16.mxu0 %v1908_v26  ;;  %v2174_v60 = vld [vmem:[%s2319_s0 + $0x28] sm:$0xff]  ;;  %v2179_v61 = vld [vmem:[%s2319_s0 + $0x30] sm:$0xff]  ;;  %v2186_v62 = vld [vmem:[%s2319_s0 + $0x38] sm:$0xff] }
  0x11   :  { %1670 = vmatprep.mubr.msk.f32.mxu0 %vm42_vm0, %v26_v10  ;;  %1911 = vmatpush3.bf16.msra.mxu0 %v1908_v26  ;;  %v2191_v63 = vld [vmem:[%s2319_s0 + $0x40] sm:$0xff]  ;;  %v2198_v0 = vld [vmem:[%s2319_s0 + $0x48] sm:$0xff]  ;;  %v2203_v1 = vld [vmem:[%s2319_s0 + $0x50] sm:$0xff] }
  0x12   :  { %1913 = vmatprep.subr.bf16.mxu0 %v1912_v28  ;;  %v2210_v2 = vld [vmem:[%s2319_s0 + $0x58] sm:$0xff]  ;;  %v2215_v3 = vld [vmem:[%s2319_s0 + $0x60] sm:$0xff]  ;;  %v2222_v4 = vld [vmem:[%s2319_s0 + $0x68] sm:$0xff] }
  0x13   :  { %v2227_v5 = vld [vmem:[%s2319_s0 + $0x70] sm:$0xff]  ;;  %v2234_v6 = vld [vmem:[%s2319_s0 + $0x78] sm:$0xff] }
  0x14   :  { %1671 = vmatmul.mubr.msk.f32.gmra.mrb[4].mxu0 %vm42_vm0, %v27_v11  ;;  %v419_v7 = vld [vmem:[%s2322_s3 + $0x30] sm:$0xff]  ;;  %v420_v8 = vld [vmem:[%s2322_s3 + $0x38] sm:$0xff]  ;;  %s2021_s3 = smov [#allocation5]  }
  0x15   :  { %1673 = vmatprep.mubr.msk.f32.mxu0 %vm42_vm0, %v28_v12  ;;  %1915 = vmatpush3.bf16.msra.mxu0 %v1912_v28  ;;  %v1920_v9 = vpack.c.bf16 %v420_v8, %v419_v7  ;;  %s1402_s20 = sshll.u32 %s2021_s3, 4  ;;  %s1403_s20 = int_to_ptr.vmem [resolvable:$true] %s1402_s20 }
  0x16   :  { %1917 = vmatprep.subr.bf16.mxu0 %v1916_v31  ;;  %s1997_s21 = scalar_lea.vmem %s1403_s20, 16  ;;  %s2001_s22 = scalar_lea.vmem %s1403_s20, 32 }
  0x17   :  { %p1998_p0 = scmp.ne.s32.totalorder %s1403_s20, %s1997_s21  ;;  %p2002_p1 = scmp.lt.s32.totalorder %s1403_s20, %s1403_s20 }
  0x18   :  { %1674 = vmatmul.mubr.msk.f32.gmra.mrb[6].mxu0 %vm42_vm0, %v29_v13  ;;  %p2003_p2 = scmp.lt.s32.totalorder %s2001_s22, %s1997_s21 }
  0x19   :  { %1676 = vmatprep.mubr.msk.f32.mxu0 %vm42_vm0, %v30_v14  ;;  %1919 = vmatpush3.bf16.msra.mxu0 %v1916_v31 }
  0x1a   :  { %1921 = vmatprep.subr.bf16.mxu0 %v1920_v9  ;;  %p2004_p3 = por %p2003_p2, %p2002_p1 }
  0x1c   :  { %1677 = vmatmul.mubr.msk.f32.gmra.mrb[8].mxu0 %vm42_vm0, %v31_v15  ;;  %p2005_p4 = pnand %p2004_p3, %p1998_p0 }
  0x1d   :  { %1679 = vmatprep.mubr.msk.f32.mxu0 %vm42_vm0, %v32_v16  ;;  %1923 = vmatpush3.bf16.msra.mxu0 %v1920_v9 }
  0x20   :  { %1680 = vmatmul.mubr.msk.f32.gmra.mrb[10].mxu0 %vm42_vm0, %v33_v17 }
  0x21   :  { %1682 = vmatprep.mubr.msk.f32.mxu0 %vm42_vm0, %v34_v18 }
  0x24   :  { %1683 = vmatmul.mubr.msk.f32.gmra.mrb[12].mxu0 %vm42_vm0, %v35_v19 }
  0x25   :  { %1685 = vmatprep.mubr.msk.f32.mxu0 %vm42_vm0, %v36_v20 }
  0x28   :  { %1686 = vmatmul.mubr.msk.f32.gmra.mrb[14].mxu0 %vm42_vm0, %v37_v21 }
  0xdf   :  { %v1666_v32 = vpop.f32.mrb[0].mxu0 }
  0xe0   :  { %v157_v33 = vpop.f32.mrb[1].mxu0 }
  0xe1   :  { %v1876_v34 = vpack.c.bf16 %v1666_v32, %v157_v33 }
  0xe3   :  { %v1669_v35 = vpop.f32.mrb[2].mxu0  ;;  %1877 = vmatprep.subr.bf16.mxu1 %v1876_v34 }
  0xe4   :  { %v167_v36 = vpop.f32.mrb[3].mxu0  ;;  %1879 = vmatpush3.bf16.msra.mxu1 %v1876_v34 }
  0xe5   :  { %v1880_v37 = vpack.c.bf16 %v1669_v35, %v167_v36 }
  0xe7   :  { %v1672_v38 = vpop.f32.mrb[4].mxu0  ;;  %1881 = vmatprep.subr.bf16.mxu1 %v1880_v37 }
  0xe8   :  { %v177_v39 = vpop.f32.mrb[5].mxu0  ;;  %1883 = vmatpush3.bf16.msra.mxu1 %v1880_v37 }
  0xe9   :  { %v1884_v40 = vpack.c.bf16 %v1672_v38, %v177_v39 }
  0xeb   :  { %v1675_v41 = vpop.f32.mrb[6].mxu0  ;;  %1885 = vmatprep.subr.bf16.mxu1 %v1884_v40 }
  0xec   :  { %v187_v42 = vpop.f32.mrb[7].mxu0  ;;  %1887 = vmatpush3.bf16.msra.mxu1 %v1884_v40 }
  0xed   :  { %v1888_v43 = vpack.c.bf16 %v1675_v41, %v187_v42 }
  0xef   :  { %v1678_v44 = vpop.f32.mrb[8].mxu0  ;;  %1889 = vmatprep.subr.bf16.mxu1 %v1888_v43 }
  0xf0   :  { %v197_v45 = vpop.f32.mrb[9].mxu0  ;;  %1891 = vmatpush3.bf16.msra.mxu1 %v1888_v43 }
  0xf1   :  { %v1892_v46 = vpack.c.bf16 %v1678_v44, %v197_v45 }
  0xf3   :  { %v1681_v47 = vpop.f32.mrb[10].mxu0  ;;  %1893 = vmatprep.subr.bf16.mxu1 %v1892_v46 }
  0xf4   :  { %v207_v48 = vpop.f32.mrb[11].mxu0  ;;  %1895 = vmatpush3.bf16.msra.mxu1 %v1892_v46 }
  0xf5   :  { %v1896_v49 = vpack.c.bf16 %v1681_v47, %v207_v48 }
  0xf7   :  { %v1684_v50 = vpop.f32.mrb[12].mxu0  ;;  %1897 = vmatprep.subr.bf16.mxu1 %v1896_v49 }
  0xf8   :  { %v217_v51 = vpop.f32.mrb[13].mxu0  ;;  %1899 = vmatpush3.bf16.msra.mxu1 %v1896_v49 }
  0xf9   :  { %v1900_v52 = vpack.c.bf16 %v1684_v50, %v217_v51 }
  0xfb   :  { %v1687_v53 = vpop.f32.mrb[14].mxu0  ;;  %1901 = vmatprep.subr.bf16.mxu1 %v1900_v52 }
  0xfc   :  { %v227_v54 = vpop.f32.mrb[15].mxu0  ;;  %1903 = vmatpush3.bf16.msra.mxu1 %v1900_v52 }
  0xfd   :  { %v1904_v55 = vpack.c.bf16 %v1687_v53, %v227_v54 }
  0xff   :  { %1905 = vmatprep.subr.bf16.mxu1 %v1904_v55 }
 0x100   :  { %1907 = vmatpush3.bf16.msra.mxu1 %v1904_v55 }
 0x103   :  { %1721 = vmatmul.mubr.f32.vlgmr.msra.gmra.mrb[0].mxu1 %v2150_v56 }
 0x104   :  { %1723 = vmatprep.mubr.f32.mxu1 %v2155_v57 }
 0x107   :  { %1724 = vmatmul.mubr.f32.gmra.mrb[2].mxu1 %v2162_v58 }
 0x108   :  { %1726 = vmatprep.mubr.f32.mxu1 %v2167_v59 }
 0x10b   :  { %1727 = vmatmul.mubr.f32.gmra.mrb[4].mxu1 %v2174_v60 }
 0x10c   :  { %1729 = vmatprep.mubr.f32.mxu1 %v2179_v61 }
 0x10f   :  { %1730 = vmatmul.mubr.f32.gmra.mrb[6].mxu1 %v2186_v62 }
 0x110   :  { %1732 = vmatprep.mubr.f32.mxu1 %v2191_v63 }
 0x113   :  { %1733 = vmatmul.mubr.f32.gmra.mrb[8].mxu1 %v2198_v0 }
 0x114   :  { %1735 = vmatprep.mubr.f32.mxu1 %v2203_v1 }
 0x117   :  { %1736 = vmatmul.mubr.f32.gmra.mrb[10].mxu1 %v2210_v2 }
 0x118   :  { %1738 = vmatprep.mubr.f32.mxu1 %v2215_v3 }
 0x11b   :  { %1739 = vmatmul.mubr.f32.gmra.mrb[12].mxu1 %v2222_v4 }
 0x11c   :  { %1741 = vmatprep.mubr.f32.mxu1 %v2227_v5 }
 0x11f   :  { %1742 = vmatmul.mubr.f32.gmra.mrb[14].mxu1 %v2234_v6 }
 0x120   :  { %1816 = vmatprep.mubr.f32.mxu1 %v2126_v22 }
 0x1d6   :  { %v1722_v10 = vpop.f32.mrb[0].mxu1 }
 0x1d7   :  { %v318_v11 = vpop.f32.mrb[1].mxu1  ;;  %v398_v13 = vmax.f32 %v1722_v10, 0.0 }
 0x1d8   :  { %v397_v12 = vmax.f32 %v318_v11, 0.0 }
 0x1da   :  { %v1725_v14 = vpop.f32.mrb[2].mxu1  ;;  %1760 = vmatprep.mubr.msk.f32.mxu0 %vm421_vm1, %v397_v12 }
 0x1db   :  { %v328_v15 = vpop.f32.mrb[3].mxu1  ;;  %1761 = vmatmul.mubr.msk.f32.vlgmr.msra.gmra.mrb[16].mxu0 %vm421_vm1, %v398_v13  ;;  %v400_v17 = vmax.f32 %v1725_v14, 0.0 }
 0x1dc   :  { %v399_v16 = vmax.f32 %v328_v15, 0.0 }
 0x1de   :  { %v1728_v18 = vpop.f32.mrb[4].mxu1  ;;  %1763 = vmatprep.mubr.msk.f32.mxu0 %vm421_vm1, %v399_v16 }
 0x1df   :  { %v338_v19 = vpop.f32.mrb[5].mxu1  ;;  %1764 = vmatmul.mubr.msk.f32.gmra.mrb[18].mxu0 %vm421_vm1, %v400_v17  ;;  %v402_v21 = vmax.f32 %v1728_v18, 0.0 }
 0x1e0   :  { %v401_v20 = vmax.f32 %v338_v19, 0.0 }
 0x1e2   :  { %v1731_v22 = vpop.f32.mrb[6].mxu1  ;;  %1766 = vmatprep.mubr.msk.f32.mxu0 %vm421_vm1, %v401_v20 }
 0x1e3   :  { %v348_v23 = vpop.f32.mrb[7].mxu1  ;;  %1767 = vmatmul.mubr.msk.f32.gmra.mrb[20].mxu0 %vm421_vm1, %v402_v21  ;;  %v404_v25 = vmax.f32 %v1731_v22, 0.0 }
 0x1e4   :  { %v403_v24 = vmax.f32 %v348_v23, 0.0 }
 0x1e6   :  { %v1734_v26 = vpop.f32.mrb[8].mxu1  ;;  %1769 = vmatprep.mubr.msk.f32.mxu0 %vm421_vm1, %v403_v24 }
 0x1e7   :  { %v358_v27 = vpop.f32.mrb[9].mxu1  ;;  %1770 = vmatmul.mubr.msk.f32.gmra.mrb[22].mxu0 %vm421_vm1, %v404_v25  ;;  %v406_v29 = vmax.f32 %v1734_v26, 0.0 }
 0x1e8   :  { %v405_v28 = vmax.f32 %v358_v27, 0.0 }
 0x1ea   :  { %v1737_v30 = vpop.f32.mrb[10].mxu1  ;;  %1772 = vmatprep.mubr.msk.f32.mxu0 %vm421_vm1, %v405_v28 }
 0x1eb   :  { %v368_v31 = vpop.f32.mrb[11].mxu1  ;;  %1773 = vmatmul.mubr.msk.f32.gmra.mrb[24].mxu0 %vm421_vm1, %v406_v29  ;;  %v408_v33 = vmax.f32 %v1737_v30, 0.0 }
 0x1ec   :  { %v407_v32 = vmax.f32 %v368_v31, 0.0 }
 0x1ee   :  { %v1740_v34 = vpop.f32.mrb[12].mxu1  ;;  %1775 = vmatprep.mubr.msk.f32.mxu0 %vm421_vm1, %v407_v32 }
 0x1ef   :  { %v378_v35 = vpop.f32.mrb[13].mxu1  ;;  %1776 = vmatmul.mubr.msk.f32.gmra.mrb[26].mxu0 %vm421_vm1, %v408_v33  ;;  %v410_v37 = vmax.f32 %v1740_v34, 0.0 }
 0x1f0   :  { %v409_v36 = vmax.f32 %v378_v35, 0.0 }
 0x1f2   :  { %v1743_v38 = vpop.f32.mrb[14].mxu1  ;;  %1778 = vmatprep.mubr.msk.f32.mxu0 %vm421_vm1, %v409_v36 }
 0x1f3   :  { %v388_v39 = vpop.f32.mrb[15].mxu1  ;;  %1779 = vmatmul.mubr.msk.f32.gmra.mrb[28].mxu0 %vm421_vm1, %v410_v37  ;;  %v412_v41 = vmax.f32 %v1743_v38, 0.0 }
 0x1f4   :  { %v411_v40 = vmax.f32 %v388_v39, 0.0 }
 0x1f6   :  { %1781 = vmatprep.mubr.msk.f32.mxu0 %vm421_vm1, %v411_v40 }
 0x1f7   :  { %1782 = vmatmul.mubr.msk.f32.gmra.mrb[30].mxu0 %vm421_vm1, %v412_v41 }
 0x2ae   :  { %v1762_v42 = vpop.f32.mrb[16].mxu0 }
 0x2af   :  { %v536_v43 = vpop.f32.mrb[17].mxu0 }
 0x2b0   :  { %v1924_v44 = vpack.c.bf16 %v1762_v42, %v536_v43 }
 0x2b2   :  { %v1765_v45 = vpop.f32.mrb[18].mxu0  ;;  %1925 = vmatprep.subr.bf16.mxu1 %v1924_v44 }
 0x2b3   :  { %v546_v46 = vpop.f32.mrb[19].mxu0  ;;  %1927 = vmatpush3.bf16.msra.mxu1 %v1924_v44 }
 0x2b4   :  { %v1928_v47 = vpack.c.bf16 %v1765_v45, %v546_v46 }
 0x2b6   :  { %v1768_v48 = vpop.f32.mrb[20].mxu0  ;;  %1929 = vmatprep.subr.bf16.mxu1 %v1928_v47 }
 0x2b7   :  { %v556_v49 = vpop.f32.mrb[21].mxu0  ;;  %1931 = vmatpush3.bf16.msra.mxu1 %v1928_v47 }
 0x2b8   :  { %v1932_v50 = vpack.c.bf16 %v1768_v48, %v556_v49 }
 0x2ba   :  { %v1771_v51 = vpop.f32.mrb[22].mxu0  ;;  %1933 = vmatprep.subr.bf16.mxu1 %v1932_v50 }
 0x2bb   :  { %v566_v52 = vpop.f32.mrb[23].mxu0  ;;  %1935 = vmatpush3.bf16.msra.mxu1 %v1932_v50 }
 0x2bc   :  { %v1936_v53 = vpack.c.bf16 %v1771_v51, %v566_v52 }
 0x2be   :  { %v1774_v54 = vpop.f32.mrb[24].mxu0  ;;  %1937 = vmatprep.subr.bf16.mxu1 %v1936_v53 }
 0x2bf   :  { %v576_v55 = vpop.f32.mrb[25].mxu0  ;;  %1939 = vmatpush3.bf16.msra.mxu1 %v1936_v53 }
 0x2c0   :  { %v1940_v7 = vpack.c.bf16 %v1774_v54, %v576_v55 }
 0x2c2   :  { %v1777_v8 = vpop.f32.mrb[26].mxu0  ;;  %1941 = vmatprep.subr.bf16.mxu1 %v1940_v7 }
 0x2c3   :  { %v586_v9 = vpop.f32.mrb[27].mxu0  ;;  %1943 = vmatpush3.bf16.msra.mxu1 %v1940_v7 }
 0x2c4   :  { %v1944_v10 = vpack.c.bf16 %v1777_v8, %v586_v9 }
 0x2c6   :  { %v1780_v11 = vpop.f32.mrb[28].mxu0  ;;  %1945 = vmatprep.subr.bf16.mxu1 %v1944_v10 }
 0x2c7   :  { %v596_v12 = vpop.f32.mrb[29].mxu0  ;;  %1947 = vmatpush3.bf16.msra.mxu1 %v1944_v10 }
 0x2c8   :  { %v1948_v13 = vpack.c.bf16 %v1780_v11, %v596_v12 }
 0x2ca   :  { %v1783_v14 = vpop.f32.mrb[30].mxu0  ;;  %1949 = vmatprep.subr.bf16.mxu1 %v1948_v13 }
 0x2cb   :  { %v606_v15 = vpop.f32.mrb[31].mxu0  ;;  %1951 = vmatpush3.bf16.msra.mxu1 %v1948_v13 }
 0x2cc   :  { %v1952_v16 = vpack.c.bf16 %v1783_v14, %v606_v15 }
 0x2ce   :  { %1953 = vmatprep.subr.bf16.mxu1 %v1952_v16 }
 0x2cf   :  { %1955 = vmatpush3.bf16.msra.mxu1 %v1952_v16 }
 0x2d2   :  { %1817 = vmatmul.mubr.f32.vlgmr.msra.gmra.mrb[16].mxu1 %v2150_v56 }
 0x2d3   :  { %1819 = vmatprep.mubr.f32.mxu1 %v2155_v57 }
 0x2d6   :  { %1820 = vmatmul.mubr.f32.gmra.mrb[18].mxu1 %v2162_v58 }
 0x2d7   :  { %1822 = vmatprep.mubr.f32.mxu1 %v2167_v59 }
 0x2da   :  { %1823 = vmatmul.mubr.f32.gmra.mrb[20].mxu1 %v2174_v60 }
 0x2db   :  { %1825 = vmatprep.mubr.f32.mxu1 %v2179_v61 }
 0x2de   :  { %1826 = vmatmul.mubr.f32.gmra.mrb[22].mxu1 %v2186_v62 }
 0x2df   :  { %1828 = vmatprep.mubr.f32.mxu1 %v2191_v63 }
 0x2e2   :  { %1829 = vmatmul.mubr.f32.gmra.mrb[24].mxu1 %v2198_v0 }
 0x2e3   :  { %1831 = vmatprep.mubr.f32.mxu1 %v2203_v1 }
 0x2e6   :  { %1832 = vmatmul.mubr.f32.gmra.mrb[26].mxu1 %v2210_v2 }
 0x2e7   :  { %1834 = vmatprep.mubr.f32.mxu1 %v2215_v3 }
 0x2ea   :  { %1835 = vmatmul.mubr.f32.gmra.mrb[28].mxu1 %v2222_v4 }
 0x2eb   :  { %1837 = vmatprep.mubr.f32.mxu1 %v2227_v5 }
 0x2ee   :  { %1838 = vmatmul.mubr.f32.gmra.mrb[30].mxu1 %v2234_v6 }
 0x3a5   :  { %v1818_v56 = vpop.f32.mrb[16].mxu1 }
 0x3a6   :  { %762 = vst.msk [vmem:[#allocation2 + $0x8] sm:$0xff] %vm760_vm2, %v1818_v56  ;;  %v681_v57 = vpop.f32.mrb[17].mxu1 }
 0x3a7   :  { %761 = vst.msk [vmem:[#allocation2] sm:$0xff] %vm760_vm2, %v681_v57  ;;  %777 = vxpose.xlu0.b32.start [1/16] (narrow) %v681_v57, 16 }
 0x3a9   :  { %v1821_v58 = vpop.f32.mrb[18].mxu1 }
 0x3aa   :  { %764 = vst.msk [vmem:[#allocation2 + $0x18] sm:$0xff] %vm760_vm2, %v1821_v58  ;;  %v691_v59 = vpop.f32.mrb[19].mxu1 }
 0x3ab   :  { %778 = vxpose.xlu0.b32.cont [2/16] (narrow) %v1818_v56, 16  ;;  %763 = vst.msk [vmem:[#allocation2 + $0x10] sm:$0xff] %vm760_vm2, %v691_v59 }
 0x3ad   :  { %v1824_v60 = vpop.f32.mrb[20].mxu1  ;;  %v832_v25 = vld [vmem:[#allocation2 + $0x8] sm:$0xff] }
 0x3ae   :  { %v831_v61 = vld [vmem:[#allocation2] sm:$0xff]  ;;  %766 = vst.msk [vmem:[#allocation2 + $0x28] sm:$0xff] %vm760_vm2, %v1824_v60  ;;  %v701_v62 = vpop.f32.mrb[21].mxu1 }
 0x3af   :  { %1844 = vmatprep.mubr.msk.f32.mxu0 %vm760_vm2, %v831_v61  ;;  %779 = vxpose.xlu0.b32.cont [3/16] (narrow) %v691_v59, 16  ;;  %765 = vst.msk [vmem:[#allocation2 + $0x20] sm:$0xff] %vm760_vm2, %v701_v62 }
 0x3b1   :  { %v1827_v63 = vpop.f32.mrb[22].mxu1  ;;  %v834_v28 = vld [vmem:[#allocation2 + $0x18] sm:$0xff] }
 0x3b2   :  { %768 = vst.msk [vmem:[#allocation2 + $0x38] sm:$0xff] %vm760_vm2, %v1827_v63  ;;  %v711_v0 = vpop.f32.mrb[23].mxu1  ;;  %v833_v27 = vld [vmem:[#allocation2 + $0x10] sm:$0xff] }
 0x3b3   :  { %780 = vxpose.xlu0.b32.cont [4/16] (narrow) %v1821_v58, 16  ;;  %767 = vst.msk [vmem:[#allocation2 + $0x30] sm:$0xff] %vm760_vm2, %v711_v0 }
 0x3b5   :  { %v1830_v1 = vpop.f32.mrb[24].mxu1  ;;  %v836_v30 = vld [vmem:[#allocation2 + $0x28] sm:$0xff] }
 0x3b6   :  { %770 = vst.msk [vmem:[#allocation2 + $0x48] sm:$0xff] %vm760_vm2, %v1830_v1  ;;  %v721_v2 = vpop.f32.mrb[25].mxu1  ;;  %v835_v29 = vld [vmem:[#allocation2 + $0x20] sm:$0xff] }
 0x3b7   :  { %781 = vxpose.xlu0.b32.cont [5/16] (narrow) %v701_v62, 16  ;;  %769 = vst.msk [vmem:[#allocation2 + $0x40] sm:$0xff] %vm760_vm2, %v721_v2 }
 0x3b9   :  { %v1833_v3 = vpop.f32.mrb[26].mxu1  ;;  %v838_v32 = vld [vmem:[#allocation2 + $0x38] sm:$0xff] }
 0x3ba   :  { %772 = vst.msk [vmem:[#allocation2 + $0x58] sm:$0xff] %vm760_vm2, %v1833_v3  ;;  %v731_v4 = vpop.f32.mrb[27].mxu1  ;;  %v837_v31 = vld [vmem:[#allocation2 + $0x30] sm:$0xff] }
 0x3bb   :  { %782 = vxpose.xlu0.b32.cont [6/16] (narrow) %v1824_v60, 16  ;;  %771 = vst.msk [vmem:[#allocation2 + $0x50] sm:$0xff] %vm760_vm2, %v731_v4 }
 0x3bd   :  { %v1836_v5 = vpop.f32.mrb[28].mxu1  ;;  %v840_v34 = vld [vmem:[#allocation2 + $0x48] sm:$0xff] }
 0x3be   :  { %774 = vst.msk [vmem:[#allocation2 + $0x68] sm:$0xff] %vm760_vm2, %v1836_v5  ;;  %v741_v6 = vpop.f32.mrb[29].mxu1  ;;  %v839_v33 = vld [vmem:[#allocation2 + $0x40] sm:$0xff] }
 0x3bf   :  { %783 = vxpose.xlu0.b32.cont [7/16] (narrow) %v711_v0, 16  ;;  %773 = vst.msk [vmem:[#allocation2 + $0x60] sm:$0xff] %vm760_vm2, %v741_v6 }
 0x3c1   :  { %v1839_v17 = vpop.f32.mrb[30].mxu1  ;;  %v842_v36 = vld [vmem:[#allocation2 + $0x58] sm:$0xff] }
 0x3c2   :  { %776 = vst.msk [vmem:[#allocation2 + $0x78] sm:$0xff] %vm760_vm2, %v1839_v17  ;;  %v751_v18 = vpop.f32.mrb[31].mxu1  ;;  %v841_v35 = vld [vmem:[#allocation2 + $0x50] sm:$0xff] }
 0x3c3   :  { %784 = vxpose.xlu0.b32.cont [8/16] (narrow) %v1827_v63, 16  ;;  %775 = vst.msk [vmem:[#allocation2 + $0x70] sm:$0xff] %vm760_vm2, %v751_v18 }
 0x3c5   :  { %v844_v38 = vld [vmem:[#allocation2 + $0x68] sm:$0xff] }
 0x3c6   :  { %v843_v37 = vld [vmem:[#allocation2 + $0x60] sm:$0xff] }
 0x3c7   :  { %785 = vxpose.xlu0.b32.cont [9/16] (narrow) %v721_v2, 16 }
 0x3c9   :  { %v846_v26 = vld [vmem:[#allocation2 + $0x78] sm:$0xff] }
 0x3ca   :  { %v845_v19 = vld [vmem:[#allocation2 + $0x70] sm:$0xff] }
 0x3cb   :  { %786 = vxpose.xlu0.b32.cont [10/16] (narrow) %v1830_v1, 16  ;;  %1865 = vmatprep.mubr.msk.f32.mxu1 %vm760_vm2, %v845_v19 }
 0x3cf   :  { %787 = vxpose.xlu0.b32.cont [11/16] (narrow) %v731_v4, 16 }
 0x3d3   :  { %788 = vxpose.xlu0.b32.cont [12/16] (narrow) %v1833_v3, 16 }
 0x3d7   :  { %789 = vxpose.xlu0.b32.cont [13/16] (narrow) %v741_v6, 16 }
 0x3db   :  { %790 = vxpose.xlu0.b32.cont [14/16] (narrow) %v1836_v5, 16 }
 0x3df   :  { %791 = vxpose.xlu0.b32.cont [15/16] (narrow) %v751_v18, 16 }
 0x3e3   :  { %792 = vxpose.xlu0.b32.end [16/16] (narrow) %v1839_v17, 16 }
 0x427   :  { %v793_v20 = vpop.trf.xlu0 }
 0x428   :  { %v809_v22 = vmul.f32 0.5, %v793_v20 }
 0x42b   :  { %v794_v21 = vpop.trf.xlu0 }
 0x42c   :  { %v810_v23 = vmul.f32 0.5, %v794_v21 }
 0x42e   :  { %v1956_v24 = vpack.c.bf16 %v810_v23, %v809_v22 }
 0x430   :  { %1957 = vmatprep.subr.bf16.mxu0 %v1956_v24  ;;  %1960 = vmatprep.subr.bf16.mxu1 %v1956_v24 }
 0x431   :  { %1959 = vmatpush3.bf16.msra.mxu0 %v1956_v24  ;;  %1961 = vmatpush3.bf16.msra.mxu1 %v1956_v24 }
 0x434   :  { %1845 = vmatmul.mubr.msk.f32.vlgmr.msra.gmra.mrb[32].mxu0 %vm760_vm2, %v832_v25  ;;  %1866 = vmatmul.mubr.msk.f32.vlgmr.msra.gmra.mrb[32].mxu1 %vm760_vm2, %v846_v26 }
 0x435   :  { %1847 = vmatprep.mubr.msk.f32.mxu0 %vm760_vm2, %v833_v27 }
 0x438   :  { %1848 = vmatmul.mubr.msk.f32.gmra.mrb[34].mxu0 %vm760_vm2, %v834_v28 }
 0x439   :  { %1850 = vmatprep.mubr.msk.f32.mxu0 %vm760_vm2, %v835_v29 }
 0x43c   :  { %1851 = vmatmul.mubr.msk.f32.gmra.mrb[36].mxu0 %vm760_vm2, %v836_v30 }
 0x43d   :  { %1853 = vmatprep.mubr.msk.f32.mxu0 %vm760_vm2, %v837_v31 }
 0x440   :  { %1854 = vmatmul.mubr.msk.f32.gmra.mrb[38].mxu0 %vm760_vm2, %v838_v32 }
 0x441   :  { %1856 = vmatprep.mubr.msk.f32.mxu0 %vm760_vm2, %v839_v33 }
 0x444   :  { %1857 = vmatmul.mubr.msk.f32.gmra.mrb[40].mxu0 %vm760_vm2, %v840_v34 }
 0x445   :  { %1859 = vmatprep.mubr.msk.f32.mxu0 %vm760_vm2, %v841_v35 }
 0x448   :  { %1860 = vmatmul.mubr.msk.f32.gmra.mrb[42].mxu0 %vm760_vm2, %v842_v36 }
 0x449   :  { %1862 = vmatprep.mubr.msk.f32.mxu0 %vm760_vm2, %v843_v37 }
 0x44c   :  { %1863 = vmatmul.mubr.msk.f32.gmra.mrb[44].mxu0 %vm760_vm2, %v844_v38 }
 0x507   :  { %v1846_v39 = vpop.f32.mrb[32].mxu0  ;;  %v1867_v40 = vpop.f32.mrb[32].mxu1 }
 0x508   :  { %1965 = vtanh.f32 %v1846_v39  ;;  %v967_v41 = vpop.f32.mrb[33].mxu0  ;;  %v1037_v42 = vpop.f32.mrb[33].mxu1 }
 0x509   :  { %1967 = vtanh.f32 %v967_v41 }
 0x50b   :  { %v1849_v43 = vpop.f32.mrb[34].mxu0 }
 0x50c   :  { %v977_v44 = vpop.f32.mrb[35].mxu0 }
 0x50d   :  { %1969 = vtanh.f32 %v977_v44 }
 0x50e   :  { %1971 = vtanh.f32 %v1849_v43 }
 0x50f   :  { %v1852_v45 = vpop.f32.mrb[36].mxu0 }
 0x510   :  { %v987_v46 = vpop.f32.mrb[37].mxu0 }
 0x511   :  { %1973 = vtanh.f32 %v987_v46 }
 0x512   :  { %v1966_v47 = vpop.eup %1965  ;;  %1975 = vtanh.f32 %v1852_v45 }
 0x513   :  { %v1855_v48 = vpop.f32.mrb[38].mxu0  ;;  %v1968_v49 = vpop.eup %1967 }
 0x514   :  { %v997_v50 = vpop.f32.mrb[39].mxu0  ;;  %v1367_v51 = vadd.f32 %v1968_v49, %v1966_v47 }
 0x515   :  { %1977 = vtanh.f32 %v997_v50 }
 0x516   :  { %1979 = vtanh.f32 %v1855_v48 }
 0x517   :  { %v1970_v52 = vpop.eup %1969  ;;  %v1858_v53 = vpop.f32.mrb[40].mxu0 }
 0x518   :  { %v1368_v54 = vadd.f32 %v1970_v52, %v1367_v51  ;;  %v1007_v55 = vpop.f32.mrb[41].mxu0  ;;  %v1972_v7 = vpop.eup %1971 }
 0x519   :  { %1981 = vtanh.f32 %v1007_v55 }
 0x51a   :  { %v1369_v8 = vadd.f32 %v1972_v7, %v1368_v54  ;;  %1983 = vtanh.f32 %v1858_v53 }
 0x51b   :  { %v1974_v9 = vpop.eup %1973  ;;  %v1861_v10 = vpop.f32.mrb[42].mxu0 }
 0x51c   :  { %v1370_v11 = vadd.f32 %v1974_v9, %v1369_v8  ;;  %v1017_v12 = vpop.f32.mrb[43].mxu0  ;;  %v1976_v13 = vpop.eup %1975 }
 0x51d   :  { %1985 = vtanh.f32 %v1017_v12 }
 0x51e   :  { %v1371_v14 = vadd.f32 %v1976_v13, %v1370_v11  ;;  %1987 = vtanh.f32 %v1861_v10 }
 0x51f   :  { %v1978_v15 = vpop.eup %1977  ;;  %v1864_v16 = vpop.f32.mrb[44].mxu0 }
 0x520   :  { %v1372_v56 = vadd.f32 %v1978_v15, %v1371_v14  ;;  %v1027_v57 = vpop.f32.mrb[45].mxu0  ;;  %v1980_v58 = vpop.eup %1979 }
 0x521   :  { %1989 = vtanh.f32 %v1027_v57 }
 0x522   :  { %v1373_v59 = vadd.f32 %v1980_v58, %v1372_v56  ;;  %1991 = vtanh.f32 %v1864_v16 }
 0x523   :  { %v1982_v60 = vpop.eup %1981  ;;  %1993 = vtanh.f32 %v1037_v42 }
 0x524   :  { %v1374_v61 = vadd.f32 %v1982_v60, %v1373_v59  ;;  %v1984_v62 = vpop.eup %1983  ;;  %1995 = vtanh.f32 %v1867_v40 }
 0x526   :  { %v1375_v63 = vadd.f32 %v1984_v62, %v1374_v61 }
 0x527   :  { %v1986_v0 = vpop.eup %1985 }
 0x528   :  { %v1376_v1 = vadd.f32 %v1986_v0, %v1375_v63  ;;  %v1988_v2 = vpop.eup %1987 }
 0x52a   :  { %v1377_v3 = vadd.f32 %v1988_v2, %v1376_v1 }
 0x52b   :  { %v1990_v4 = vpop.eup %1989 }
 0x52c   :  { %v1378_v5 = vadd.f32 %v1990_v4, %v1377_v3  ;;  %v1992_v6 = vpop.eup %1991 }
 0x52d   :  { %v1994_v18 = vpop.eup %1993 }
 0x52e   :  { %v1379_v17 = vadd.f32 %v1992_v6, %v1378_v5  ;;  %v1996_v20 = vpop.eup %1995 }
 0x530   :  { %v1380_v19 = vadd.f32 %v1994_v18, %v1379_v17 }
 0x532   :  { %v1381_v21 = vadd.f32 %v1996_v20, %v1380_v19 }
 0x534   :  { %1382 = vadd.xlane.f32.xlu1 %v1381_v21 }
 0x5c1   :  { %v1383_v22 = vpop.xlane.xlu1 %1382 }
 0x5c2   :  { %v1384_v23 = vrot.slane %v1383_v22, 4 }
 0x5c4   :  { %v1385_v24 = vadd.f32 %v1384_v23, %v1383_v22 }
 0x5c6   :  { %v1386_v25 = vrot.slane %v1385_v24, 2 }
 0x5c8   :  { %v1387_v26 = vadd.f32 %v1386_v25, %v1385_v24 }
 0x5ca   :  { %v1388_v27 = vrot.slane %v1387_v26, 1 }
 0x5cc   :  { %v1389_v28 = vadd.f32 %v1388_v27, %v1387_v26 }
 0x5ce   :  { %1962 = vpush %v1389_v28 }
 0x5ff   :  { %s1963_s0 = spop %1962 }
 0x600   :  { %v1391_v29 = vstv %s1963_s0 }
 0x601   :  { %v1392_v30 = vmul.f32 3.0517578e-05, %v1391_v29 }
 0x603   :  { %v1393_v31 = vadd.f32 0.5, %v1392_v30 }
 0x605   :  { %1395 = vst.msk [vmem:[#allocation5] sm:$0x1] %vm1394_vm3, %v1393_v31 }
 0x606   :  { %2008 = shalt.err (!%p2005_p4)
}
 0x607   :  { %s2009_s25 = scalar_lea.hbm %s2323_s4, 16 }
 0x608   :  { %p2010_p5 = scmp.ne.s32.totalorder %s2323_s4, %s2009_s25  ;;  %p2013_p6 = scmp.lt.u32.totalorder %s2009_s25, %s2323_s4 }
 0x60a   :  { %p2015_p7 = pnand %p2013_p6, %p2010_p5 }
 0x60c   :  { %2018 = shalt.err (!%p2015_p7)
}
 0x60d   :  { %1405 = dma.vmem_to_hbm [thread:$0]  %s1403_s20, 16, %s2323_s4, [#allocation6]  }
 0x60e   :  { %2019 = dma.done.wait [#allocation6], 16  }
 0x60f   :  { %2020 = vsyncadd [#allocation6], 4294967280 }
 0x610   :  { %1409 = vsyncpa [#allocation6], 1 }

</bundles_post_ra>
